<compile_context>
chip_gen: v7x
topology: tpu7x:2x2x1
jax: 0.10.0
libtpu: 0.0.40
codegen_flags: <defaults>
</compile_context>

<pallas_src>
import functools

import jax
import jax.numpy as jnp
from jax.experimental import pallas as pl
from jax.experimental.pallas import tpu as pltpu


def _relu_kernel(bias_ref, x_ref, o_ref, *, soft: bool, soft_beta: float):
    """Elementwise: out = non_linear(x - bias). bias is an f32 scalar in SMEM."""
    b = bias_ref[0]                                  # f32 scalar
    zf = x_ref[...].astype(jnp.float32) - b          # compute in f32 on all paths
    if not soft:
        o_ref[...] = jnp.maximum(zf, 0.0).astype(o_ref.dtype)
    else:
        # PyTorch Softplus(beta): (1/beta) * log1p(exp(beta*z)); if beta*z > 20
        # return z directly (threshold=20).  inv_beta is a trace-time constant
        # (splat multiply, not an f32 divide).
        inv_beta = 1.0 / float(soft_beta)
        bz = jnp.float32(soft_beta) * zf
        sp = jnp.log1p(jnp.exp(jnp.minimum(bz, jnp.float32(20.0)))) * jnp.float32(inv_beta)
        o_ref[...] = jnp.where(bz > 20.0, zf, sp).astype(o_ref.dtype)


def _round_up(n: int, m: int) -> int:
    return (n + m - 1) // m * m


def _vmem_budget():
    """Per-generation (block_bytes, vmem_limit_bytes)."""
    try:
        cap = int(pltpu.get_tpu_info().vmem_capacity_bytes)
    except Exception:
        cap = 64 * 1024 * 1024  # conservative (v7x per-TC)
    if cap >= 100 * 1024 * 1024:          # v5e / v6e: 128 MiB VMEM
        return 16 * 1024 * 1024, 96 * 1024 * 1024
    return 8 * 1024 * 1024, 48 * 1024 * 1024   # v7x: 64 MiB VMEM per TC


@functools.partial(jax.jit, static_argnames=("positive_bias", "soft", "soft_beta"))
def relu_forward(
    x: jax.Array,
    bias_raw: jax.Array,
    *,
    positive_bias: bool = False,
    soft: bool = False,
    soft_beta: float = 10.0,
) -> jax.Array:
    """Pallas-backed equivalent of Relu.forward for NCHW (or any-shape) input x."""
    # bias property: square the raw parameter when positive_bias=True (glue).
    bias = jnp.square(bias_raw) if positive_bias else bias_raw
    bias = bias.reshape((1,)).astype(jnp.float32)

    orig_shape = x.shape
    n = x.size
    itemsize = jnp.dtype(x.dtype).itemsize
    sub = max(8, 32 // itemsize)          # packed sublane count: 8 f32 / 16 bf16 / 32 i8

    # Adaptive lane width: largest multiple of 128 in {1024..128} that divides
    # numel -> reshape is a zero-copy bitcast and stores stay unmasked.
    lane = None
    for cand in (1024, 512, 256, 128):
        if n >= cand and n % cand == 0:
            lane = cand
            break

    x_flat = x.reshape(-1)
    padded = n
    if lane is None:
        # Fallback for numel not divisible by 128: tiny pad (< 128 elements).
        lane = 128
        padded = _round_up(max(n, lane), lane)
        x_flat = jnp.pad(x_flat, (0, padded - n))
    rows = padded // lane
    x2d = x_flat.reshape(rows, lane)

    block_bytes, vmem_limit = _vmem_budget()
    # Row-tile size: ~block_bytes per block, multiple of the packed sublane
    # count, and >= 2 grid blocks whenever rows allows it (megacore split).
    target_rows = max(sub, (block_bytes // (lane * itemsize)) // sub * sub)
    if rows <= sub:
        tr = rows                                   # full-extent block (allowed)
    else:
        tr = min(target_rows, _round_up(pl.cdiv(rows, 2), sub))
    grid = (pl.cdiv(rows, tr),)                     # trailing partial block is masked

    kernel = functools.partial(_relu_kernel, soft=soft, soft_beta=soft_beta)

    out2d = pl.pallas_call(
        kernel,
        out_shape=jax.ShapeDtypeStruct((rows, lane), x.dtype),
        grid_spec=pltpu.PrefetchScalarGridSpec(
            num_scalar_prefetch=0,
            grid=grid,
            in_specs=[
                pl.BlockSpec(memory_space=pltpu.SMEM),        # scalar bias (1,) f32
                pl.BlockSpec((tr, lane), lambda i: (i, 0)),   # lane-dense row tile
            ],
            out_specs=pl.BlockSpec((tr, lane), lambda i: (i, 0)),
        ),
        compiler_params=pltpu.CompilerParams(
            dimension_semantics=("parallel",),                # megacore / v7x 2-TC
            vmem_limit_bytes=vmem_limit,
        ),
    )(bias, x2d)

    out_flat = out2d.reshape(-1)
    if padded != n:
        out_flat = out_flat[:n]                     # only on the rare pad fallback
    return out_flat.reshape(orig_shape)


def _reference(x, bias_raw, positive_bias, soft, soft_beta):
    bias = jnp.square(bias_raw) if positive_bias else bias_raw
    z = x - bias.reshape(())
    if not soft:
        return jnp.maximum(z, 0.0)
    bz = soft_beta * z
    sp = jnp.log1p(jnp.exp(jnp.minimum(bz, 20.0))) / soft_beta
    return jnp.where(bz > 20.0, z, sp)


if __name__ == "__main__":
    key = jax.random.PRNGKey(0)
    kx, kb = jax.random.split(key)

    # Small NCHW input, consistent with a generic feature map.
    B, C, H, W = 2, 4, 16, 16
    x = jax.random.normal(kx, (B, C, H, W), dtype=jnp.float32)

    # Deterministic parameter (module default bias_value=None -> zeros((1,));
    # use a nonzero value to exercise the subtraction path).
    bias_raw = jnp.asarray([0.3], dtype=jnp.float32)

    # Hard ReLU variant (soft=False), positive_bias=True (bias = bias_raw**2).
    out_hard = relu_forward(x, bias_raw, positive_bias=True, soft=False)
    out_hard = jax.block_until_ready(out_hard)
    ref_hard = _reference(x, bias_raw, True, False, 10.0)
    assert out_hard.shape == x.shape
    assert jnp.allclose(out_hard, ref_hard, atol=1e-6), "hard ReLU mismatch"

    # Softplus variant (soft=True, beta=10).
    out_soft = relu_forward(x, bias_raw, positive_bias=False, soft=True, soft_beta=10.0)
    out_soft = jax.block_until_ready(out_soft)
    ref_soft = _reference(x, bias_raw, False, True, 10.0)
    assert jnp.allclose(out_soft, ref_soft, atol=1e-5), "softplus mismatch"

    # Odd-sized input exercising the non-divisible-by-128 fallback path.
    x_odd = jax.random.normal(kb, (3, 5, 7), dtype=jnp.float32)
    out_odd = jax.block_until_ready(relu_forward(x_odd, bias_raw, soft=False))
    assert jnp.allclose(out_odd, _reference(x_odd, bias_raw, False, False, 10.0), atol=1e-6)

    print("KERNEL_OK")
</pallas_src>

<mosaic_0001>
module attributes {stable_mosaic.version = 11 : i64} {
  func.func @_relu_kernel(%arg0: i32, %arg1: memref<1xf32, #tpu.memory_space<smem>>, %arg2: memref<2x1024xf32, #tpu.memory_space<vmem>>, %arg3: memref<2x1024xf32, #tpu.memory_space<vmem>>) attributes {dimension_semantics = [#tpu.dimension_semantics<parallel>], iteration_bounds = array<i64: 1>, scalar_prefetch = 0 : i64, scratch_operands = 0 : i64, tpu.core_type = #tpu.core_type<tc>, window_params = [{transform_indices = @transform_0, window_bounds = array<i64: 1>}, {transform_indices = @transform_1, window_bounds = array<i64: 2, 1024>}, {transform_indices = @transform_2, window_bounds = array<i64: 2, 1024>}]} {
    %c0 = arith.constant 0 : index
    %0 = memref.load %arg1[%c0] : memref<1xf32, #tpu.memory_space<smem>>
    %c0_0 = arith.constant 0 : index
    %c0_1 = arith.constant 0 : index
    %1 = vector.load %arg2[%c0_0, %c0_1] : memref<2x1024xf32, #tpu.memory_space<vmem>>, vector<2x1024xf32>
    %2 = vector.broadcast %0 : f32 to vector<2x1024xf32>
    %3 = arith.subf %1, %2 : vector<2x1024xf32>
    %cst = arith.constant 0.000000e+00 : f32
    %4 = vector.broadcast %cst : f32 to vector<2x1024xf32>
    %5 = arith.maximumf %3, %4 : vector<2x1024xf32>
    %c0_2 = arith.constant 0 : index
    %c0_3 = arith.constant 0 : index
    %6 = vector.load %arg3[%c0_2, %c0_3] : memref<2x1024xf32, #tpu.memory_space<vmem>>, vector<2x1024xf32>
    tpu.vector_store %arg3[%c0_2, %c0_3], %5 {strides = array<i32>} : memref<2x1024xf32, #tpu.memory_space<vmem>>, vector<2x1024xf32>,
    return
  }
  func.func @transform_0(%arg0: i32) -> i32 {
    %c0_i32 = arith.constant 0 : i32
    %c0_i32_0 = arith.constant 0 : i32
    return %c0_i32 : i32
  }
  func.func @transform_1(%arg0: i32) -> (i32, i32) {
    %c0_i32 = arith.constant 0 : i32
    %c0_i32_0 = arith.constant 0 : i32
    return %arg0, %c0_i32 : i32, i32
  }
  func.func @transform_2(%arg0: i32) -> (i32, i32) {
    %c0_i32 = arith.constant 0 : i32
    %c0_i32_0 = arith.constant 0 : i32
    return %arg0, %c0_i32 : i32, i32
  }
}

</mosaic_0001>

<bundles_post_ra>
// kernel: relu_forward.1
= control target key start
LH: loop header
LB: loop body
LE: loop exit
PB: predicated region body
PF: predicated region fallthrough
CT: control target
= control target key end

     0   :  { %s56_s0 = inlined_call_operand.<no memory space> [shape: f32[1], index: 0, kind: input, shape index: {}]   ;;  %s57_s1 = inlined_call_operand.vmem [shape: f32[2,1024], index: 1, kind: input, shape index: {}]   ;;  %s58_s2 = inlined_call_operand.vmem [shape: f32[2,1024], index: 2, kind: output, shape index: {}]  }
   0x1   :  { %v13_v0 = vld [vmem:[%s57_s1] sm:$0xff]  ;;  %v15_v1 = vstv %s56_s0  ;;  %v14_v2 = vld [vmem:[%s57_s1 + $0x8] sm:$0xff] }
   0x2   :  { %v16_v3 = vsub.f32 %v13_v0, %v15_v1  ;;  %v17_v4 = vsub.f32 %v14_v2, %v15_v1 }
   0x4   :  { %v18_v5 = vmax.f32 %v16_v3, 0.0  ;;  %v19_v6 = vmax.f32 %v17_v4, 0.0 }
   0x6   :  { %20 = vst [vmem:[%s58_s2] sm:$0xff] %v18_v5  ;;  %21 = vst [vmem:[%s58_s2 + $0x8] sm:$0xff] %v19_v6 }

</bundles_post_ra>
